<compile_context>
chip_gen: v7x
topology: tpu7x:2x2x1
jax: 0.10.0
libtpu: 0.0.40
codegen_flags: <defaults>
</compile_context>

<pallas_src>
import jax
import jax.numpy as jnp
from jax.experimental import pallas as pl
from jax.experimental.pallas import tpu as pltpu


def _round_up(x, m):
    return ((x + m - 1) // m) * m


def critic_kernel(x_ref, w1_ref, b1_ref, w2_ref, b2_ref, w3_ref, b3_ref, o_ref):
    # x_ref: (obs_p, TILE_B) in compute dtype (batch on lanes).
    x = x_ref[...]

    # Layer 1: W1 @ x  (MXU, f32 accumulate), bias + ReLU in f32 on the VPU.
    h = jnp.dot(w1_ref[...], x, preferred_element_type=jnp.float32)
    h = jnp.maximum(h + b1_ref[...], 0.0)

    # Layer 2: cast activations back to the compute dtype only for the dot.
    h = jnp.dot(w2_ref[...], h.astype(w2_ref.dtype), preferred_element_type=jnp.float32)
    h = jnp.maximum(h + b2_ref[...], 0.0)

    # Output layer (width 1): VPU multiply + sublane reduction instead of an
    # MXU matmul that would use a single row/column of the systolic array.
    # w3_ref is (h2_p, 1) f32, h is (h2_p, TILE_B) f32 -> (1, TILE_B).
    v = jnp.sum(h * w3_ref[...], axis=0, keepdims=True) + b3_ref[...]

    o_ref[...] = v.astype(o_ref.dtype)  # lane-dense (1, TILE_B) store


def critic_forward(obs, params, *, compute_dtype=jnp.bfloat16, tile_b=512):
    """Value head forward.

    obs:    (B, obs_size) float32 (PyTorch layout; transposed internally).
    params: [(W1, b1), (W2, b2), (W3, b3)] with W (out, in), b (out,) — the
            same layout as torch.nn.Linear.
    """
    (W1, b1), (W2, b2), (W3, b3) = params
    B, obs_size = obs.shape
    h1, h2 = W1.shape[0], W2.shape[0]

    # Padded (sublane-aligned) feature dims and lane-aligned batch tiles.
    obs_p = _round_up(obs_size, 8)
    h1_p = _round_up(h1, 8)
    h2_p = _round_up(h2, 8)
    TILE_B = min(tile_b, _round_up(B, 128))
    B_pad = _round_up(B, TILE_B)

    cd = compute_dtype
    # Batch-on-lanes activations, zero padded (padded rows/cols contribute 0).
    xT = jnp.pad(obs.T, ((0, obs_p - obs_size), (0, B_pad - B))).astype(cd)
    w1 = jnp.pad(W1, ((0, h1_p - h1), (0, obs_p - obs_size))).astype(cd)
    w2 = jnp.pad(W2, ((0, h2_p - h2), (0, h1_p - h1))).astype(cd)
    # Final layer weight as a (h2_p, 1) f32 column for the VPU reduction.
    w3c = jnp.pad(W3.reshape(-1, 1), ((0, h2_p - h2), (0, 0))).astype(jnp.float32)
    b1c = jnp.pad(b1.reshape(-1, 1), ((0, h1_p - h1), (0, 0))).astype(jnp.float32)
    b2c = jnp.pad(b2.reshape(-1, 1), ((0, h2_p - h2), (0, 0))).astype(jnp.float32)
    b3c = b3.reshape(1, 1).astype(jnp.float32)

    grid = (B_pad // TILE_B,)
    resident = lambda shape: pl.BlockSpec(shape, lambda i: (0, 0))

    out = pl.pallas_call(
        critic_kernel,
        out_shape=jax.ShapeDtypeStruct((1, B_pad), jnp.float32),
        grid=grid,
        in_specs=[
            pl.BlockSpec((obs_p, TILE_B), lambda i: (0, i)),  # obs tile (pipelined)
            resident(w1.shape), resident(b1c.shape),
            resident(w2.shape), resident(b2c.shape),
            resident(w3c.shape), resident(b3c.shape),
        ],
        out_specs=pl.BlockSpec((1, TILE_B), lambda i: (0, i)),  # lane-dense output
        compiler_params=pltpu.CompilerParams(
            dimension_semantics=("parallel",),
        ),
    )(xT, w1, b1c, w2, b2c, w3c, b3c)

    # Layout plumbing back to the PyTorch-shaped (B, 1) value tensor.
    return out[0, :B].reshape(B, 1)


def init_params(key, sizes):
    """nn.Linear-style init: W (out, in), b (out,), uniform(+-1/sqrt(fan_in))."""
    params = []
    for in_f, out_f in zip(sizes[:-1], sizes[1:]):
        key, kw, kb = jax.random.split(key, 3)
        bound = 1.0 / jnp.sqrt(jnp.float32(in_f))
        W = jax.random.uniform(kw, (out_f, in_f), jnp.float32, -bound, bound)
        b = jax.random.uniform(kb, (out_f,), jnp.float32, -bound, bound)
        params.append((W, b))
    return params


def critic_ref(obs, params, compute_dtype=jnp.float32):
    """Pure-JAX reference of the same MLP with matching dot dtypes."""
    (W1, b1), (W2, b2), (W3, b3) = params
    cd = compute_dtype
    h = jnp.dot(obs.astype(cd), W1.T.astype(cd),
                preferred_element_type=jnp.float32) + b1
    h = jnp.maximum(h, 0.0)
    h = jnp.dot(h.astype(cd), W2.T.astype(cd),
                preferred_element_type=jnp.float32) + b2
    h = jnp.maximum(h, 0.0)
    return h @ W3.T.astype(jnp.float32) + b3


if __name__ == "__main__":
    # obs_size=16, args.hidden_sizes=[32, 32] -> v_size = [16, 32, 32, 1]
    obs_size = 16
    hidden_sizes = [32, 32]
    sizes = [obs_size] + hidden_sizes + [1]
    batch = 8  # NOTE: at this size the call is launch-overhead dominated; the
               # layout/grid wins only pay off at large B or when fused bigger.

    key = jax.random.PRNGKey(0)
    key, kobs = jax.random.split(key)
    obs = jax.random.normal(kobs, (batch, obs_size), jnp.float32)
    params = init_params(key, sizes)

    # f32 path (v5e-friendly): exact-tolerance check against the f32 reference.
    out_f32 = jax.block_until_ready(
        critic_forward(obs, params, compute_dtype=jnp.float32))
    ref_f32 = critic_ref(obs, params, compute_dtype=jnp.float32)
    assert out_f32.shape == (batch, 1)
    assert jnp.allclose(out_f32, ref_f32, atol=1e-5, rtol=1e-5)

    # bf16-dot path (v6e/v7x): check against a reference using the same
    # bf16 dots + f32 accumulation, plus a loose check against pure f32.
    out_bf16 = jax.block_until_ready(
        critic_forward(obs, params, compute_dtype=jnp.bfloat16))
    ref_bf16 = critic_ref(obs, params, compute_dtype=jnp.bfloat16)
    assert out_bf16.shape == (batch, 1)
    assert jnp.allclose(out_bf16, ref_bf16, atol=1e-2, rtol=1e-2)
    assert jnp.allclose(out_bf16, ref_f32, atol=5e-2, rtol=5e-2)

    print("KERNEL_OK")
</pallas_src>

<mosaic_0001>
module attributes {stable_mosaic.version = 11 : i64} {
  func.func @critic_kernel(%arg0: i32, %arg1: memref<16x128xf32, #tpu.memory_space<vmem>>, %arg2: memref<32x16xf32, #tpu.memory_space<vmem>>, %arg3: memref<32x1xf32, #tpu.memory_space<vmem>>, %arg4: memref<32x32xf32, #tpu.memory_space<vmem>>, %arg5: memref<32x1xf32, #tpu.memory_space<vmem>>, %arg6: memref<32x1xf32, #tpu.memory_space<vmem>>, %arg7: memref<1x1xf32, #tpu.memory_space<vmem>>, %arg8: memref<1x128xf32, #tpu.memory_space<vmem>>) attributes {dimension_semantics = [#tpu.dimension_semantics<parallel>], iteration_bounds = array<i64: 1>, scalar_prefetch = 0 : i64, scratch_operands = 0 : i64, tpu.core_type = #tpu.core_type<tc>, window_params = [{transform_indices = @transform_0, window_bounds = array<i64: 16, 128>}, {pipeline_mode = #tpu.pipeline_mode<synchronous>, transform_indices = @transform_1, window_bounds = array<i64: 32, 16>}, {pipeline_mode = #tpu.pipeline_mode<synchronous>, transform_indices = @transform_2, window_bounds = array<i64: 32, 1>}, {pipeline_mode = #tpu.pipeline_mode<synchronous>, transform_indices = @transform_3, window_bounds = array<i64: 32, 32>}, {pipeline_mode = #tpu.pipeline_mode<synchronous>, transform_indices = @transform_4, window_bounds = array<i64: 32, 1>}, {pipeline_mode = #tpu.pipeline_mode<synchronous>, transform_indices = @transform_5, window_bounds = array<i64: 32, 1>}, {pipeline_mode = #tpu.pipeline_mode<synchronous>, transform_indices = @transform_6, window_bounds = array<i64: 1, 1>}, {transform_indices = @transform_7, window_bounds = array<i64: 1, 128>}]} {
    %c0 = arith.constant 0 : index
    %c0_0 = arith.constant 0 : index
    %0 = vector.load %arg1[%c0, %c0_0] : memref<16x128xf32, #tpu.memory_space<vmem>>, vector<16x128xf32>
    %c0_1 = arith.constant 0 : index
    %c0_2 = arith.constant 0 : index
    %1 = vector.load %arg2[%c0_1, %c0_2] : memref<32x16xf32, #tpu.memory_space<vmem>>, vector<32x16xf32>
    %cst = arith.constant dense<0.000000e+00> : vector<32x128xf32>
    %2 = tpu.matmul %1, %0, %cst {dimension_numbers = #tpu.dot_dimension_numbers<[1], [0], [0], [1], [0, 0, 1, 1], [], []>} : vector<32x16xf32>, vector<16x128xf32>, vector<32x128xf32> -> vector<32x128xf32>
    %c0_3 = arith.constant 0 : index
    %c0_4 = arith.constant 0 : index
    %3 = vector.load %arg3[%c0_3, %c0_4] : memref<32x1xf32, #tpu.memory_space<vmem>>, vector<32x1xf32>
    %4 = vector.broadcast %3 : vector<32x1xf32> to vector<32x128xf32>
    %5 = arith.addf %2, %4 : vector<32x128xf32>
    %cst_5 = arith.constant 0.000000e+00 : f32
    %6 = vector.broadcast %cst_5 : f32 to vector<32x128xf32>
    %7 = arith.maximumf %5, %6 : vector<32x128xf32>
    %c0_6 = arith.constant 0 : index
    %c0_7 = arith.constant 0 : index
    %8 = vector.load %arg4[%c0_6, %c0_7] : memref<32x32xf32, #tpu.memory_space<vmem>>, vector<32x32xf32>
    %cst_8 = arith.constant dense<0.000000e+00> : vector<32x128xf32>
    %9 = tpu.matmul %8, %7, %cst_8 {dimension_numbers = #tpu.dot_dimension_numbers<[1], [0], [0], [1], [0, 0, 1, 1], [], []>} : vector<32x32xf32>, vector<32x128xf32>, vector<32x128xf32> -> vector<32x128xf32>
    %c0_9 = arith.constant 0 : index
    %c0_10 = arith.constant 0 : index
    %10 = vector.load %arg5[%c0_9, %c0_10] : memref<32x1xf32, #tpu.memory_space<vmem>>, vector<32x1xf32>
    %11 = vector.broadcast %10 : vector<32x1xf32> to vector<32x128xf32>
    %12 = arith.addf %9, %11 : vector<32x128xf32>
    %cst_11 = arith.constant 0.000000e+00 : f32
    %13 = vector.broadcast %cst_11 : f32 to vector<32x128xf32>
    %14 = arith.maximumf %12, %13 : vector<32x128xf32>
    %c0_12 = arith.constant 0 : index
    %c0_13 = arith.constant 0 : index
    %15 = vector.load %arg6[%c0_12, %c0_13] : memref<32x1xf32, #tpu.memory_space<vmem>>, vector<32x1xf32>
    %16 = vector.broadcast %15 : vector<32x1xf32> to vector<32x128xf32>
    %17 = arith.mulf %14, %16 : vector<32x128xf32>
    %cst_14 = arith.constant dense<0.000000e+00> : vector<128xf32>
    %18 = vector.multi_reduction <add>, %17, %cst_14 [0] : vector<32x128xf32> to vector<128xf32>
    %19 = vector.shape_cast %18 : vector<128xf32> to vector<1x128xf32>
    %c0_15 = arith.constant 0 : index
    %c0_16 = arith.constant 0 : index
    %20 = vector.load %arg7[%c0_15, %c0_16] : memref<1x1xf32, #tpu.memory_space<vmem>>, vector<1x1xf32>
    %21 = vector.broadcast %20 : vector<1x1xf32> to vector<1x128xf32>
    %22 = arith.addf %19, %21 : vector<1x128xf32>
    %c0_17 = arith.constant 0 : index
    %c0_18 = arith.constant 0 : index
    %23 = vector.load %arg8[%c0_17, %c0_18] : memref<1x128xf32, #tpu.memory_space<vmem>>, vector<1x128xf32>
    tpu.vector_store %arg8[%c0_17, %c0_18], %22 {strides = array<i32>} : memref<1x128xf32, #tpu.memory_space<vmem>>, vector<1x128xf32>,
    return
  }
  func.func @transform_0(%arg0: i32) -> (i32, i32) {
    %c0_i32 = arith.constant 0 : i32
    %c0_i32_0 = arith.constant 0 : i32
    return %c0_i32, %arg0 : i32, i32
  }
  func.func @transform_1(%arg0: i32) -> (i32, i32) {
    %c0_i32 = arith.constant 0 : i32
    %c0_i32_0 = arith.constant 0 : i32
    %c0_i32_1 = arith.constant 0 : i32
    return %c0_i32, %c0_i32_0 : i32, i32
  }
  func.func @transform_2(%arg0: i32) -> (i32, i32) {
    %c0_i32 = arith.constant 0 : i32
    %c0_i32_0 = arith.constant 0 : i32
    %c0_i32_1 = arith.constant 0 : i32
    return %c0_i32, %c0_i32_0 : i32, i32
  }
  func.func @transform_3(%arg0: i32) -> (i32, i32) {
    %c0_i32 = arith.constant 0 : i32
    %c0_i32_0 = arith.constant 0 : i32
    %c0_i32_1 = arith.constant 0 : i32
    return %c0_i32, %c0_i32_0 : i32, i32
  }
  func.func @transform_4(%arg0: i32) -> (i32, i32) {
    %c0_i32 = arith.constant 0 : i32
    %c0_i32_0 = arith.constant 0 : i32
    %c0_i32_1 = arith.constant 0 : i32
    return %c0_i32, %c0_i32_0 : i32, i32
  }
  func.func @transform_5(%arg0: i32) -> (i32, i32) {
    %c0_i32 = arith.constant 0 : i32
    %c0_i32_0 = arith.constant 0 : i32
    %c0_i32_1 = arith.constant 0 : i32
    return %c0_i32, %c0_i32_0 : i32, i32
  }
  func.func @transform_6(%arg0: i32) -> (i32, i32) {
    %c0_i32 = arith.constant 0 : i32
    %c0_i32_0 = arith.constant 0 : i32
    %c0_i32_1 = arith.constant 0 : i32
    return %c0_i32, %c0_i32_0 : i32, i32
  }
  func.func @transform_7(%arg0: i32) -> (i32, i32) {
    %c0_i32 = arith.constant 0 : i32
    %c0_i32_0 = arith.constant 0 : i32
    return %c0_i32, %arg0 : i32, i32
  }
}

</mosaic_0001>

<bundles_post_ra>
// kernel: tpu_custom_call.1
= control target key start
LH: loop header
LB: loop body
LE: loop exit
PB: predicated region body
PF: predicated region fallthrough
CT: control target
= control target key end

     0   :  { %s571_s0 = inlined_call_operand.vmem [shape: f32[16,128], index: 0, kind: input, shape index: {}]   ;;  %s572_s1 = inlined_call_operand.vmem [shape: f32[32,16], index: 1, kind: input, shape index: {}]   ;;  %s573_s2 = inlined_call_operand.vmem [shape: f32[32,1], index: 2, kind: input, shape index: {}]   ;;  %s574_s3 = inlined_call_operand.vmem [shape: f32[32,32], index: 3, kind: input, shape index: {}]   ;;  %s575_s4 = inlined_call_operand.vmem [shape: f32[32,1], index: 4, kind: input, shape index: {}]   ;;  %s576_s5 = inlined_call_operand.vmem [shape: f32[32,1], index: 5, kind: input, shape index: {}]   ;;  %s577_s6 = inlined_call_operand.<no memory space> [shape: f32[1,1], index: 6, kind: input, shape index: {}]   ;;  %s578_s7 = inlined_call_operand.hbm [shape: f32[1,128], index: 7, kind: output, shape index: {}]  }
   0x1   :  { %v12_v0 = vstv %s577_s6 }
   0x2   :  { %13 = vst [vmem:[#allocation2] sm:$0x1] %v12_v0 }
   0x3   :  { %v29_v1 = vld [vmem:[%s571_s0] sm:$0xff]  ;;  %v30_v2 = vld [vmem:[%s571_s0 + $0x8] sm:$0xff]  ;;  %vm59_vm0 = vcmask 130048   ;;  %v440_v5 = vmov 0   ;;  %v37_v7 = vld [vmem:[%s573_s2 + $0x10] sm:$0xff] }
   0x4   :  { %v31_v3 = vld [vmem:[%s572_s1] sm:$0xff]  ;;  %v400_v4 = vpack.c.bf16 %v30_v2, %v29_v1  ;;  %414 = vset.pattern.permute.xlu0 %v440_v5  ;;  %415 = vset.pattern.permute.xlu1 %v440_v5  ;;  %v32_v8 = vld [vmem:[%s572_s1 + $0x8] sm:$0xff]  ;;  %v33_v10 = vld [vmem:[%s572_s1 + $0x10] sm:$0xff] }
   0x5   :  { %380 = vmatprep.mubr.msk.f32.mxu0 %vm59_vm0, %v31_v3  ;;  %v35_v6 = vld [vmem:[%s573_s2] sm:$0xff]  ;;  %v36_v9 = vld [vmem:[%s573_s2 + $0x8] sm:$0xff]  ;;  %51 = vperm.xlu1 %415, %v37_v7   ;;  %v38_v11 = vld [vmem:[%s573_s2 + $0x18] sm:$0xff] }
   0x6   :  { %401 = vmatprep.subr.bf16.mxu0 %v400_v4  ;;  %41 = vperm.xlu0 %414, %v35_v6  }
   0x7   :  { %403 = vmatpush3.bf16.msra.mxu0 %v400_v4 }
   0x8   :  { %14 = vsyncpa [#allocation4], 0  ;;  %v34_v12 = vld [vmem:[%s572_s1 + $0x18] sm:$0xff]  ;;  %v165_v13 = vld [vmem:[%s575_s4] sm:$0xff]  ;;  %vm189_vm1 = vcmask 261120   ;;  %v334_v6 = vlaneseq }
   0x9   :  { %56 = vperm.xlu1 %415, %v38_v11   ;;  %v166_v14 = vld [vmem:[%s575_s4 + $0x8] sm:$0xff]  ;;  %v167_v15 = vld [vmem:[%s575_s4 + $0x10] sm:$0xff]  ;;  %v168_v16 = vld [vmem:[%s575_s4 + $0x18] sm:$0xff] }
   0xa   :  { %381 = vmatmul.mubr.msk.f32.vlgmr.msra.gmra.mrb[0].mxu0 %vm59_vm0, %v32_v8  ;;  %46 = vperm.xlu0 %414, %v36_v9   ;;  %v291_v17 = vld [vmem:[%s576_s5] sm:$0xff]  ;;  %v292_v18 = vld [vmem:[%s576_s5 + $0x8] sm:$0xff]  ;;  %v293_v19 = vld [vmem:[%s576_s5 + $0x10] sm:$0xff]  ;;  %v335_v9 = vshrl.u32 %v334_v6, 7 }
   0xb   :  { %383 = vmatprep.mubr.msk.f32.mxu0 %vm59_vm0, %v33_v10  ;;  %v294_v20 = vld [vmem:[%s576_s5 + $0x18] sm:$0xff]  ;;  %v328_v21 = vld [vmem:[#allocation2] sm:$0x1]  ;;  %v162_v41 = vld [vmem:[%s574_s3 + $0x8] sm:$0xff] }
   0xc   :  { %v161_v22 = vld [vmem:[%s574_s3] sm:$0xff]  ;;  %v163_v42 = vld [vmem:[%s574_s3 + $0x10] sm:$0xff]  ;;  %v164_v43 = vld [vmem:[%s574_s3 + $0x18] sm:$0xff]  ;;  %s441_s3 = smov [#allocation3]  }
   0xd   :  { %176 = vperm.xlu1 %415, %v166_v14   ;;  %394 = vmatprep.mubr.msk.f32.mxu1 %vm189_vm1, %v161_v22  ;;  %s346_s16 = sshll.u32 %s441_s3, 4  ;;  %s347_s16 = int_to_ptr.vmem [resolvable:$true] %s346_s16 }
   0xe   :  { %384 = vmatmul.mubr.msk.f32.gmra.mrb[2].mxu0 %vm59_vm0, %v34_v12  ;;  %171 = vperm.xlu0 %414, %v165_v13   ;;  %v336_v12 = vsub.s32 0, %v335_v9  ;;  %s416_s17 = scalar_lea.vmem %s347_s16, 16  ;;  %s420_s18 = scalar_lea.vmem %s347_s16, 32 }
   0xf   :  { %p417_p0 = scmp.ne.s32.totalorder %s347_s16, %s416_s17  ;;  %p421_p1 = scmp.lt.s32.totalorder %s347_s16, %s347_s16 }
  0x10   :  { %p422_p2 = scmp.lt.s32.totalorder %s420_s18, %s416_s17 }
  0x11   :  { %186 = vperm.xlu1 %415, %v168_v16  }
  0x12   :  { %181 = vperm.xlu0 %414, %v167_v15   ;;  %p423_p3 = por %p422_p2, %p421_p1 }
  0x14   :  { %p424_p4 = pnand %p423_p3, %p417_p0 }
  0x15   :  { %302 = vperm.xlu1 %415, %v292_v18  }
  0x16   :  { %297 = vperm.xlu0 %414, %v291_v17  }
  0x19   :  { %312 = vperm.xlu1 %415, %v294_v20  }
  0x1a   :  { %307 = vperm.xlu0 %414, %v293_v19  }
  0x1e   :  { %331 = vperm.xlu0 %414, %v328_v21  }
  0x84   :  { %v52_v24 = vpop.permute.xlu1 %51 }
  0x85   :  { %v42_v23 = vpop.permute.xlu0 %41 }
  0x88   :  { %v57_v31 = vpop.permute.xlu1 %56 }
  0x89   :  { %v47_v25 = vpop.permute.xlu0 %46 }
  0x8c   :  { %v177_v45 = vpop.permute.xlu1 %176 }
  0x8d   :  { %v172_v44 = vpop.permute.xlu0 %171 }
  0x90   :  { %v187_v47 = vpop.permute.xlu1 %186 }
  0x91   :  { %v182_v46 = vpop.permute.xlu0 %181 }
  0x94   :  { %v303_v54 = vpop.permute.xlu1 %302 }
  0x95   :  { %v298_v52 = vpop.permute.xlu0 %297 }
  0x98   :  { %v313_v3 = vpop.permute.xlu1 %312 }
  0x99   :  { %v308_v1 = vpop.permute.xlu0 %307 }
  0x9d   :  { %v332_v14 = vpop.permute.xlu0 %331 }
  0x9e   :  { %v337_v16 = vrot.slane %v332_v14, %v336_v12 }
  0xdd   :  { %v382_v26 = vpop.f32.mrb[0].mxu0 }
  0xde   :  { %v144_v27 = vadd.f32 %v382_v26, %v47_v25  ;;  %v138_v28 = vpop.f32.mrb[1].mxu0 }
  0xdf   :  { %v139_v29 = vadd.f32 %v138_v28, %v42_v23 }
  0xe0   :  { %v158_v30 = vmax.f32 %v144_v27, 0.0 }
  0xe1   :  { %v157_v32 = vmax.f32 %v139_v29, 0.0  ;;  %v385_v33 = vpop.f32.mrb[2].mxu0 }
  0xe2   :  { %v154_v34 = vadd.f32 %v385_v33, %v57_v31  ;;  %v148_v35 = vpop.f32.mrb[3].mxu0 }
  0xe3   :  { %v149_v36 = vadd.f32 %v148_v35, %v52_v24  ;;  %v404_v37 = vpack.c.bf16 %v158_v30, %v157_v32 }
  0xe4   :  { %v160_v38 = vmax.f32 %v154_v34, 0.0 }
  0xe5   :  { %v159_v39 = vmax.f32 %v149_v36, 0.0  ;;  %405 = vmatprep.subr.bf16.mxu1 %v404_v37 }
  0xe6   :  { %407 = vmatpush3.bf16.msra.mxu1 %v404_v37 }
  0xe7   :  { %v408_v40 = vpack.c.bf16 %v160_v38, %v159_v39 }
  0xe9   :  { %409 = vmatprep.subr.bf16.mxu1 %v408_v40 }
  0xea   :  { %411 = vmatpush3.bf16.msra.mxu1 %v408_v40 }
  0xed   :  { %395 = vmatmul.mubr.msk.f32.vlgmr.msra.gmra.mrb[0].mxu1 %vm189_vm1, %v162_v41 }
  0xee   :  { %397 = vmatprep.mubr.msk.f32.mxu1 %vm189_vm1, %v163_v42 }
  0xf1   :  { %398 = vmatmul.mubr.msk.f32.gmra.mrb[2].mxu1 %vm189_vm1, %v164_v43 }
 0x1c0   :  { %v396_v48 = vpop.f32.mrb[0].mxu1 }
 0x1c1   :  { %v274_v49 = vadd.f32 %v396_v48, %v177_v45  ;;  %v268_v50 = vpop.f32.mrb[1].mxu1 }
 0x1c2   :  { %v269_v51 = vadd.f32 %v268_v50, %v172_v44 }
 0x1c3   :  { %v288_v53 = vmax.f32 %v274_v49, 0.0 }
 0x1c4   :  { %v287_v55 = vmax.f32 %v269_v51, 0.0  ;;  %v399_v56 = vpop.f32.mrb[2].mxu1 }
 0x1c5   :  { %v316_v57 = vmul.f32 %v303_v54, %v288_v53  ;;  %v284_v58 = vadd.f32 %v399_v56, %v187_v47  ;;  %v278_v59 = vpop.f32.mrb[3].mxu1 }
 0x1c6   :  { %v315_v60 = vmul.f32 %v298_v52, %v287_v55  ;;  %v279_v61 = vadd.f32 %v278_v59, %v182_v46 }
 0x1c7   :  { %v290_v63 = vmax.f32 %v284_v58, 0.0 }
 0x1c8   :  { %v319_v62 = vadd.f32 %v316_v57, %v315_v60  ;;  %v289_v0 = vmax.f32 %v279_v61, 0.0 }
 0x1c9   :  { %v318_v4 = vmul.f32 %v313_v3, %v290_v63 }
 0x1ca   :  { %v317_v2 = vmul.f32 %v308_v1, %v289_v0 }
 0x1cc   :  { %v320_v5 = vadd.f32 %v319_v62, %v317_v2 }
 0x1ce   :  { %v321_v7 = vadd.f32 %v320_v5, %v318_v4 }
 0x1d0   :  { %v322_v8 = vrot.slane %v321_v7, 4 }
 0x1d2   :  { %v323_v10 = vadd.f32 %v322_v8, %v321_v7 }
 0x1d4   :  { %v324_v11 = vrot.slane %v323_v10, 2 }
 0x1d6   :  { %v325_v13 = vadd.f32 %v324_v11, %v323_v10 }
 0x1d8   :  { %v326_v15 = vrot.slane %v325_v13, 1 }
 0x1da   :  { %v327_v17 = vadd.f32 %v326_v15, %v325_v13 }
 0x1dc   :  { %v338_v18 = vadd.f32 %v337_v16, %v327_v17 }
 0x1de   :  { %339 = vst [vmem:[#allocation3] sm:$0x1] %v338_v18 }
 0x1df   :  { %427 = shalt.err (!%p424_p4)
}
 0x1e0   :  { %s428_s21 = scalar_lea.hbm %s578_s7, 16 }
 0x1e1   :  { %p429_p5 = scmp.ne.s32.totalorder %s578_s7, %s428_s21  ;;  %p432_p6 = scmp.lt.u32.totalorder %s428_s21, %s578_s7 }
 0x1e3   :  { %p434_p7 = pnand %p432_p6, %p429_p5 }
 0x1e5   :  { %437 = shalt.err (!%p434_p7)
}
 0x1e6   :  { %349 = dma.vmem_to_hbm [thread:$0]  %s347_s16, 16, %s578_s7, [#allocation4]  }
 0x1e7   :  { %438 = dma.done.wait [#allocation4], 16  }
 0x1e8   :  { %439 = vsyncadd [#allocation4], 4294967280 }
 0x1e9   :  { %353 = vsyncpa [#allocation4], 1 }

</bundles_post_ra>
